<compile_context>
chip_gen: v7x
topology: tpu7x:2x2x1
jax: 0.10.0
libtpu: 0.0.40
codegen_flags: <defaults>
</compile_context>

<pallas_src>
import jax
import jax.numpy as jnp
from jax.experimental import pallas as pl
from jax.experimental.pallas import tpu as pltpu


def _value_net_kernel(x_ref, w1_ref, b1_ref, w2_ref, b2_ref, o_ref):
    # fc1 on the MXU: (TB, In) @ (In, H) with f32 accumulation; bias + ReLU on VPU.
    h = jnp.dot(x_ref[...], w1_ref[...], preferred_element_type=jnp.float32)
    h = jnp.maximum(h + b1_ref[...], 0.0)
    # fc2 with output_size == 1: VPU multiply + lane reduce against the (1, H)
    # weight row (avoids an MXU push/pop for a K=H, N=1 tile); b2 from SMEM.
    y = jnp.sum(h * w2_ref[...], axis=-1) + b2_ref[0]            # (TB,)
    # Lane-dense store: one (1, TB) row per tile.
    o_ref[...] = y.reshape(1, -1).astype(o_ref.dtype)


def value_network_forward(state, w1, b1, w2_row, b2, *, tile_b=512):
    """Fused forward of ValueNetwork (output_size == 1).

    state : (B, input_size) f32
    w1    : (input_size, hidden) f32   (fc1 weight, pre-transposed to (in, out))
    b1    : (1, hidden) f32
    w2_row: (1, hidden) f32            (fc2 weight row for the single output)
    b2    : (1,) f32
    returns (B, 1) f32  ==  relu(state @ w1 + b1) @ w2_row.T + b2
    """
    B, in_size = state.shape
    hidden = w1.shape[1]
    assert w1.shape == (in_size, hidden)
    assert b1.shape == (1, hidden)
    assert w2_row.shape == (1, hidden)
    assert b2.shape == (1,)

    # Batch tiling. tile_b is a multiple of 8 and 128 so the (TB, In) input
    # block and lane-dense (1, TB) output block are both legal when the grid
    # has more than one step. Small batches use a single full-array block.
    if B <= tile_b:
        tb, b_padded = B, B
        x = state
    else:
        tb = tile_b
        b_padded = pl.cdiv(B, tb) * tb
        x = jnp.pad(state, ((0, b_padded - B), (0, 0))) if b_padded != B else state
    num_tiles = b_padded // tb

    out_row = pl.pallas_call(
        _value_net_kernel,
        out_shape=jax.ShapeDtypeStruct((1, b_padded), jnp.float32),
        grid=(num_tiles,),
        in_specs=[
            pl.BlockSpec((tb, in_size), lambda i: (i, 0)),       # state tile
            pl.BlockSpec((in_size, hidden), lambda i: (0, 0)),   # w1 (resident)
            pl.BlockSpec((1, hidden), lambda i: (0, 0)),         # b1 (resident)
            pl.BlockSpec((1, hidden), lambda i: (0, 0)),         # w2 row (resident)
            pl.BlockSpec(memory_space=pltpu.MemorySpace.SMEM),   # b2 scalar
        ],
        out_specs=pl.BlockSpec((1, tb), lambda i: (0, i)),
        compiler_params=pltpu.CompilerParams(
            dimension_semantics=("parallel",),   # megacore sharding on v7x
        ),
    )(x, w1, b1, w2_row, b2)

    # Wrapper-side relayout back to the PyTorch (B, 1) shape.
    return out_row[0, :B].reshape(B, 1)


def init_params(key, input_size, hidden_size):
    """nn.Linear-style uniform(-1/sqrt(fan_in), 1/sqrt(fan_in)) init, output_size=1."""
    k1, k2, k3, k4 = jax.random.split(key, 4)
    bound1 = 1.0 / jnp.sqrt(float(input_size))
    bound2 = 1.0 / jnp.sqrt(float(hidden_size))
    w1 = jax.random.uniform(k1, (input_size, hidden_size), jnp.float32, -bound1, bound1)
    b1 = jax.random.uniform(k2, (1, hidden_size), jnp.float32, -bound1, bound1)
    w2_row = jax.random.uniform(k3, (1, hidden_size), jnp.float32, -bound2, bound2)
    b2 = jax.random.uniform(k4, (1,), jnp.float32, -bound2, bound2)
    return w1, b1, w2_row, b2


if __name__ == "__main__":
    key = jax.random.PRNGKey(0)
    input_size, hidden_size = 4, 32   # CartPole-style value head, output_size = 1

    pkey, xkey1, xkey2 = jax.random.split(key, 3)
    w1, b1, w2_row, b2 = init_params(pkey, input_size, hidden_size)

    def ref_fn(s):
        return jnp.maximum(s @ w1 + b1, 0.0) @ w2_row.T + b2

    # Small single-tile case (grid of 1, full-array blocks).
    state_small = jax.random.normal(xkey1, (8, input_size), dtype=jnp.float32)
    out_small = jax.block_until_ready(
        value_network_forward(state_small, w1, b1, w2_row, b2))
    assert out_small.shape == (8, 1)
    assert jnp.allclose(out_small, ref_fn(state_small), atol=1e-5), "small-batch mismatch"

    # Multi-tile case exercising the batch grid + padding (grid of 2).
    state_big = jax.random.normal(xkey2, (600, input_size), dtype=jnp.float32)
    out_big = jax.block_until_ready(
        value_network_forward(state_big, w1, b1, w2_row, b2))
    assert out_big.shape == (600, 1)
    assert jnp.allclose(out_big, ref_fn(state_big), atol=1e-5), "tiled-batch mismatch"

    print("KERNEL_OK")
</pallas_src>

<mosaic_0001>
module attributes {stable_mosaic.version = 11 : i64} {
  func.func @_value_net_kernel(%arg0: i32, %arg1: memref<8x4xf32, #tpu.memory_space<vmem>>, %arg2: memref<4x32xf32, #tpu.memory_space<vmem>>, %arg3: memref<1x32xf32, #tpu.memory_space<vmem>>, %arg4: memref<1x32xf32, #tpu.memory_space<vmem>>, %arg5: memref<1xf32, #tpu.memory_space<smem>>, %arg6: memref<1x8xf32, #tpu.memory_space<vmem>>) attributes {dimension_semantics = [#tpu.dimension_semantics<parallel>], iteration_bounds = array<i64: 1>, scalar_prefetch = 0 : i64, scratch_operands = 0 : i64, tpu.core_type = #tpu.core_type<tc>, window_params = [{transform_indices = @transform_0, window_bounds = array<i64: 8, 4>}, {pipeline_mode = #tpu.pipeline_mode<synchronous>, transform_indices = @transform_1, window_bounds = array<i64: 4, 32>}, {pipeline_mode = #tpu.pipeline_mode<synchronous>, transform_indices = @transform_2, window_bounds = array<i64: 1, 32>}, {pipeline_mode = #tpu.pipeline_mode<synchronous>, transform_indices = @transform_3, window_bounds = array<i64: 1, 32>}, {transform_indices = @transform_4, window_bounds = array<i64: 1>}, {transform_indices = @transform_5, window_bounds = array<i64: 1, 8>}]} {
    %c0 = arith.constant 0 : index
    %c0_0 = arith.constant 0 : index
    %0 = vector.load %arg1[%c0, %c0_0] : memref<8x4xf32, #tpu.memory_space<vmem>>, vector<8x4xf32>
    %c0_1 = arith.constant 0 : index
    %c0_2 = arith.constant 0 : index
    %1 = vector.load %arg2[%c0_1, %c0_2] : memref<4x32xf32, #tpu.memory_space<vmem>>, vector<4x32xf32>
    %cst = arith.constant dense<0.000000e+00> : vector<8x32xf32>
    %2 = tpu.matmul %0, %1, %cst {dimension_numbers = #tpu.dot_dimension_numbers<[1], [0], [0], [1], [0, 0, 1, 1], [], []>} : vector<8x4xf32>, vector<4x32xf32>, vector<8x32xf32> -> vector<8x32xf32>
    %c0_3 = arith.constant 0 : index
    %c0_4 = arith.constant 0 : index
    %3 = vector.load %arg3[%c0_3, %c0_4] : memref<1x32xf32, #tpu.memory_space<vmem>>, vector<1x32xf32>
    %4 = vector.broadcast %3 : vector<1x32xf32> to vector<8x32xf32>
    %5 = arith.addf %2, %4 : vector<8x32xf32>
    %cst_5 = arith.constant 0.000000e+00 : f32
    %6 = vector.broadcast %cst_5 : f32 to vector<8x32xf32>
    %7 = arith.maximumf %5, %6 : vector<8x32xf32>
    %c0_6 = arith.constant 0 : index
    %c0_7 = arith.constant 0 : index
    %8 = vector.load %arg4[%c0_6, %c0_7] : memref<1x32xf32, #tpu.memory_space<vmem>>, vector<1x32xf32>
    %9 = vector.broadcast %8 : vector<1x32xf32> to vector<8x32xf32>
    %10 = arith.mulf %7, %9 : vector<8x32xf32>
    %cst_8 = arith.constant dense<0.000000e+00> : vector<8xf32>
    %11 = vector.multi_reduction <add>, %10, %cst_8 [1] : vector<8x32xf32> to vector<8xf32>
    %c0_9 = arith.constant 0 : index
    %12 = memref.load %arg5[%c0_9] : memref<1xf32, #tpu.memory_space<smem>>
    %13 = vector.broadcast %12 : f32 to vector<8xf32>
    %14 = arith.addf %11, %13 : vector<8xf32>
    %15 = vector.shape_cast %14 : vector<8xf32> to vector<1x8xf32>
    %c0_10 = arith.constant 0 : index
    %c0_11 = arith.constant 0 : index
    %16 = vector.load %arg6[%c0_10, %c0_11] : memref<1x8xf32, #tpu.memory_space<vmem>>, vector<1x8xf32>
    tpu.vector_store %arg6[%c0_10, %c0_11], %15 {strides = array<i32>} : memref<1x8xf32, #tpu.memory_space<vmem>>, vector<1x8xf32>,
    return
  }
  func.func @transform_0(%arg0: i32) -> (i32, i32) {
    %c0_i32 = arith.constant 0 : i32
    %c0_i32_0 = arith.constant 0 : i32
    return %arg0, %c0_i32 : i32, i32
  }
  func.func @transform_1(%arg0: i32) -> (i32, i32) {
    %c0_i32 = arith.constant 0 : i32
    %c0_i32_0 = arith.constant 0 : i32
    %c0_i32_1 = arith.constant 0 : i32
    return %c0_i32, %c0_i32_0 : i32, i32
  }
  func.func @transform_2(%arg0: i32) -> (i32, i32) {
    %c0_i32 = arith.constant 0 : i32
    %c0_i32_0 = arith.constant 0 : i32
    %c0_i32_1 = arith.constant 0 : i32
    return %c0_i32, %c0_i32_0 : i32, i32
  }
  func.func @transform_3(%arg0: i32) -> (i32, i32) {
    %c0_i32 = arith.constant 0 : i32
    %c0_i32_0 = arith.constant 0 : i32
    %c0_i32_1 = arith.constant 0 : i32
    return %c0_i32, %c0_i32_0 : i32, i32
  }
  func.func @transform_4(%arg0: i32) -> i32 {
    %c0_i32 = arith.constant 0 : i32
    %c0_i32_0 = arith.constant 0 : i32
    return %c0_i32 : i32
  }
  func.func @transform_5(%arg0: i32) -> (i32, i32) {
    %c0_i32 = arith.constant 0 : i32
    %c0_i32_0 = arith.constant 0 : i32
    return %c0_i32, %arg0 : i32, i32
  }
}

</mosaic_0001>

<bundles_post_ra>
// kernel: tpu_custom_call.1
= control target key start
LH: loop header
LB: loop body
LE: loop exit
PB: predicated region body
PF: predicated region fallthrough
CT: control target
= control target key end

     0   :  { %vm35_vm0 = vcmask 1043456   ;;  %v187_v2 = vmov 0.0   ;;  %vm188_vm1 = vmmov 0   ;;  %vm31_vm2 = vcmask 31744   ;;  %s247_s0 = inlined_call_operand.vmem [shape: f32[8,4], index: 0, kind: input, shape index: {}]   ;;  %s248_s1 = inlined_call_operand.vmem [shape: f32[4,32], index: 1, kind: input, shape index: {}]   ;;  %s249_s2 = inlined_call_operand.vmem [shape: f32[1,32], index: 2, kind: input, shape index: {}]   ;;  %s250_s3 = inlined_call_operand.vmem [shape: f32[1,32], index: 3, kind: input, shape index: {}]   ;;  %s251_s4 = inlined_call_operand.<no memory space> [shape: f32[1], index: 4, kind: input, shape index: {}]   ;;  %s252_s5 = inlined_call_operand.hbm [shape: f32[1,8], index: 5, kind: output, shape index: {}]  }
   0x1   :  { %v23_v0 = vld [vmem:[%s248_s1] sm:$0xf]  ;;  %155 = vmatprep.subr.mxu0 %v187_v2  ;;  %157 = vmatprep.mubr.msk.f32.mxu0 %vm188_vm1, %v187_v2 }
   0x2   :  { %v22_v1 = vld [vmem:[%s247_s0] sm:$0xff] }
   0x3   :  { %11 = vsyncpa [#allocation4], 0  ;;  %156 = vmatpush3.msk.msra.mxu0 %vm35_vm0, %v23_v0  ;;  %v149_v3 = vld [vmem:[%s249_s2] ss:$0 sm:$0xff]  ;;  %vm118_vm3 = vcmask 261120   ;;  %v126_v11 = vlaneseq  ;;  %v123_v14 = vstv %s251_s4  ;;  %s189_s2 = smov [#allocation3]  }
   0x4   :  { %158 = vmatmul.mubr.msk.f32.vlgmr.msra.gmra.mrb[0].mxu0 %vm31_vm2, %v22_v1  ;;  %v152_v7 = vld [vmem:[%s250_s3] ss:$0 sm:$0xff]  ;;  %s141_s26 = sshll.u32 %s189_s2, 4  ;;  %vm133_vm4 = vcmask 57344   ;;  %s142_s26 = int_to_ptr.vmem [resolvable:$true] %s141_s26 }
   0x5   :  { %v127_v12 = vand.u32 127, %v126_v11  ;;  %v129_v13 = vshrl.u32 %v126_v11, 7  ;;  %s163_s3 = scalar_lea.vmem %s142_s26, 16  ;;  %s167_s27 = scalar_lea.vmem %s142_s26, 32 }
   0x6   :  { %p164_p0 = scmp.ne.s32.totalorder %s142_s26, %s163_s3  ;;  %p168_p1 = scmp.lt.s32.totalorder %s142_s26, %s142_s26 }
   0x7   :  { %v130_v15 = vsub.s32 %v127_v12, %v129_v13  ;;  %p169_p2 = scmp.lt.s32.totalorder %s167_s27, %s163_s3 }
   0x9   :  { %p170_p3 = por %p169_p2, %p168_p1 }
   0xb   :  { %p171_p4 = pnand %p170_p3, %p164_p0 }
  0xd7   :  { %v105_v4 = vpop.f32.mrb[0].mxu0 }
  0xd8   :  { %v106_v5 = vadd.f32 %v149_v3, %v105_v4  ;;  %v159_v6 = vpop.f32.mrb[1].mxu0 }
  0xda   :  { %v109_v8 = vmax.f32 %v106_v5, 0.0 }
  0xdc   :  { %v117_v9 = vmul.f32 %v152_v7, %v109_v8 }
  0xde   :  { %v119_v10 = vsel %vm118_vm3, %v117_v9, 0.0 }
  0xdf   :  { %120 = vadd.xlane.f32.xlu0 %v119_v10 }
 0x16c   :  { %v121_v16 = vpop.xlane.xlu0 %120 }
 0x16d   :  { %v124_v17 = vadd.f32 %v123_v14, %v121_v16 }
 0x16f   :  { %v131_v18 = vrot.slane %v124_v17, %v130_v15 }
 0x171   :  { %134 = vst.msk [vmem:[#allocation3] sm:$0x1] %vm133_vm4, %v131_v18 }
 0x172   :  { %174 = shalt.err (!%p171_p4)
}
 0x173   :  { %s175_s4 = scalar_lea.hbm %s252_s5, 16 }
 0x174   :  { %p176_p5 = scmp.ne.s32.totalorder %s252_s5, %s175_s4  ;;  %p179_p6 = scmp.lt.u32.totalorder %s175_s4, %s252_s5 }
 0x176   :  { %p181_p7 = pnand %p179_p6, %p176_p5 }
 0x178   :  { %184 = shalt.err (!%p181_p7)
}
 0x179   :  { %144 = dma.vmem_to_hbm [thread:$0]  %s142_s26, 16, %s252_s5, [#allocation4]  }
 0x17a   :  { %185 = dma.done.wait [#allocation4], 16  }
 0x17b   :  { %186 = vsyncadd [#allocation4], 4294967280 }
 0x17c   :  { %148 = vsyncpa [#allocation4], 1 }

</bundles_post_ra>
